<compile_context>
chip_gen: v7x
topology: tpu7x:2x2x1
jax: 0.10.0
libtpu: 0.0.40
codegen_flags: <defaults>
</compile_context>

<pallas_src>
import functools

import jax
import jax.numpy as jnp
from jax.experimental import pallas as pl
from jax.experimental.pallas import tpu as pltpu

EPS = 1e-5  # PyTorch InstanceNorm2d default eps (affine=False)


def _residual_block_kernel(x_ref, w1_ref, w2_ref, o_ref, pad_ref, col_ref,
                           *, height, width, compute_dtype):
    """One image: the whole residual block, fused. Channel-major flat layout.

    x_ref:   (1, C, H*W)        input tile (channels on sublanes, pixels on lanes)
    w1_ref:  (C, 9*C)           conv1 weights, (c_out, tap*C + c_in)
    w2_ref:  (C, 9*C)           conv2 weights
    o_ref:   (1, C, H*W)        output tile
    pad_ref: (C, (H+2)*W + 2)   VMEM scratch: H-reflect-padded flat stage input
    col_ref: (9*C, H*W)         VMEM scratch: im2col slab (tap-major rows)
    """
    _, C, HW = o_ref.shape
    H, W = height, width
    OFF = 1                      # flat scratch holds the image at lane offset 1
    inv_n = 1.0 / float(HW)

    # Column-position masks for the W-direction reflection fixups (hoisted,
    # shared by both stages and all taps).
    w_idx = jax.lax.broadcasted_iota(jnp.int32, (C, HW), 1) % W
    left_mask = w_idx == 0            # pixels with w == 0
    right_mask = w_idx == (W - 1)     # pixels with w == W-1

    def fill_pad(src):
        # src: (C, H*W) value in compute_dtype, row-major flattened spatial.
        # Writes rows 0..H+1 of the H-reflect-padded image, flat, at offset OFF.
        pad_ref[:, OFF + W: OFF + W + HW] = src                                   # rows 1..H
        pad_ref[:, OFF: OFF + W] = src[:, W: 2 * W]                               # row 0  = row 1
        pad_ref[:, OFF + (H + 1) * W: OFF + (H + 2) * W] = (
            src[:, (H - 2) * W: (H - 1) * W])                                     # row H+1 = row H-2

    def build_im2col():
        # For each vertical tap i (row offset i-1), three lane-shifted slabs of
        # the flat padded image give the {-1, 0, +1} column shifts; reflection
        # at w==0 / w==W-1 is a single jnp.where fixup per shifted slab.
        for i in range(3):
            base = i * W
            a = pad_ref[:, base: base + HW]              # column shift -1 (raw)
            b = pad_ref[:, base + 1: base + 1 + HW]      # column shift  0
            c = pad_ref[:, base + 2: base + 2 + HW]      # column shift +1 (raw)
            col_ref[(i * 3 + 0) * C:(i * 3 + 1) * C, :] = jnp.where(left_mask, c, a)
            col_ref[(i * 3 + 1) * C:(i * 3 + 2) * C, :] = b
            col_ref[(i * 3 + 2) * C:(i * 3 + 3) * C, :] = jnp.where(right_mask, a, c)

    def conv_instance_norm(w_ref, relu):
        # Single MXU matmul: (C, 9C) @ (9C, H*W) with f32 accumulation.
        acc = jnp.dot(w_ref[...], col_ref[...],
                      preferred_element_type=jnp.float32)        # (C, H*W) f32
        # One-pass stats over the lane (pixel) axis: biased variance.
        s = jnp.sum(acc, axis=1, keepdims=True)
        ss = jnp.sum(acc * acc, axis=1, keepdims=True)
        mean = s * inv_n
        var = ss * inv_n - mean * mean
        y = (acc - mean) * jax.lax.rsqrt(var + EPS)
        if relu:
            y = jnp.maximum(y, 0.0)
        return y  # (C, H*W) f32

    x = x_ref[0]  # (C, H*W), input dtype

    # Stage 1: reflect-pad(x) -> conv1 -> IN -> ReLU (bias canceled by IN).
    fill_pad(x.astype(compute_dtype))
    build_im2col()
    y1 = conv_instance_norm(w1_ref, relu=True)

    # Stage 2: reflect-pad(y1) -> conv2 -> IN  (y1 never leaves VMEM).
    fill_pad(y1.astype(compute_dtype))
    build_im2col()
    y2 = conv_instance_norm(w2_ref, relu=False)

    # Residual add; single lane-dense HBM write of the final result.
    o_ref[0] = (y2 + x.astype(jnp.float32)).astype(o_ref.dtype)


def residual_block_forward(x_nchw, params, *, compute_dtype=jnp.bfloat16):
    """x_nchw: (N, C, H, W) float32. Returns (N, C, H, W)."""
    w1, b1, w2, b2 = params
    del b1, b2  # exactly canceled by InstanceNorm2d(affine=False) mean subtraction

    N, C, H, W = x_nchw.shape
    HW = H * W
    pad_w = (H + 2) * W + 2

    # Free reshape: NCHW with spatial flattened -> pixels land on the lane axis.
    x = x_nchw.reshape(N, C, HW)

    def flat_w(w):
        # (kh, kw, c_in, c_out) -> (c_out, tap*C + c_in), tap = kh*3 + kw,
        # matching the im2col slab row order.
        return jnp.transpose(w, (3, 0, 1, 2)).reshape(C, 9 * C).astype(compute_dtype)

    w1f = flat_w(w1)
    w2f = flat_w(w2)

    kernel = functools.partial(_residual_block_kernel,
                               height=H, width=W, compute_dtype=compute_dtype)

    isz = x.dtype.itemsize
    csz = jnp.dtype(compute_dtype).itemsize
    cost = pl.CostEstimate(
        flops=int(2 * 2 * N * HW * (9 * C) * C),        # 2 stages of matmul
        transcendentals=int(2 * N * C),                 # rsqrt per channel/stage
        bytes_accessed=int(2 * x.size * isz + (w1f.size + w2f.size) * csz),
    )

    y = pl.pallas_call(
        kernel,
        out_shape=jax.ShapeDtypeStruct((N, C, HW), x.dtype),
        grid_spec=pltpu.PrefetchScalarGridSpec(
            num_scalar_prefetch=0,
            grid=(N,),
            in_specs=[
                pl.BlockSpec((1, C, HW), lambda n: (n, 0, 0)),
                pl.BlockSpec((C, 9 * C), lambda n: (0, 0)),
                pl.BlockSpec((C, 9 * C), lambda n: (0, 0)),
            ],
            out_specs=pl.BlockSpec((1, C, HW), lambda n: (n, 0, 0)),
            scratch_shapes=[
                pltpu.VMEM((C, pad_w), compute_dtype),    # flat padded stage input
                pltpu.VMEM((9 * C, HW), compute_dtype),   # im2col slab
            ],
        ),
        compiler_params=pltpu.CompilerParams(
            dimension_semantics=("parallel",),
        ),
        cost_estimate=cost,
    )(x, w1f, w2f)

    return y.reshape(N, C, H, W)


def init_params(key, channels):
    """Deterministic synthetic weights: conv weights as (kh, kw, c_in, c_out)."""
    k1, k2, k3, k4 = jax.random.split(key, 4)
    scale = 1.0 / jnp.sqrt(9.0 * channels)
    w1 = jax.random.uniform(k1, (3, 3, channels, channels),
                            jnp.float32, -scale, scale)
    b1 = jax.random.uniform(k2, (1, channels), jnp.float32, -scale, scale)
    w2 = jax.random.uniform(k3, (3, 3, channels, channels),
                            jnp.float32, -scale, scale)
    b2 = jax.random.uniform(k4, (1, channels), jnp.float32, -scale, scale)
    return (w1, b1, w2, b2)


def _reference_forward(x_nchw, params):
    """Pure-JAX reference (same math, XLA conv; includes the conv bias)."""
    w1, b1, w2, b2 = params

    def conv_in(x, w, b):  # x: NHWC, w: (kh,kw,cin,cout)
        xp = jnp.pad(x, ((0, 0), (1, 1), (1, 1), (0, 0)), mode="reflect")
        y = jax.lax.conv_general_dilated(
            xp, w, window_strides=(1, 1), padding="VALID",
            dimension_numbers=("NHWC", "HWIO", "NHWC"))
        y = y + b[0]
        mean = jnp.mean(y, axis=(1, 2), keepdims=True)
        var = jnp.mean((y - mean) ** 2, axis=(1, 2), keepdims=True)
        return (y - mean) * jax.lax.rsqrt(var + EPS)

    x = jnp.transpose(x_nchw, (0, 2, 3, 1))
    y = jnp.maximum(conv_in(x, w1, b1), 0.0)
    y = conv_in(y, w2, b2) + x
    return jnp.transpose(y, (0, 3, 1, 2))


if __name__ == "__main__":
    N, C, H, W = 2, 8, 16, 16
    key = jax.random.PRNGKey(0)
    kx, kp = jax.random.split(key)
    x = jax.random.normal(kx, (N, C, H, W), jnp.float32)
    params = init_params(kp, C)

    ref = jax.block_until_ready(_reference_forward(x, params))

    # f32 MXU path: checks the fused structure (padding / im2col / IN / residual).
    out_f32 = jax.block_until_ready(
        residual_block_forward(x, params, compute_dtype=jnp.float32))
    assert out_f32.shape == (N, C, H, W)
    assert jnp.allclose(out_f32, ref, rtol=1e-2, atol=1e-2), "f32 path mismatch"

    # Default fast path: bf16 MXU inputs, f32 accumulation / stats.
    out_bf16 = jax.block_until_ready(residual_block_forward(x, params))
    assert out_bf16.shape == (N, C, H, W)
    assert jnp.allclose(out_bf16, ref, rtol=5e-2, atol=5e-2), "bf16 path mismatch"

    print("KERNEL_OK")
</pallas_src>

<mosaic_0001>
module attributes {stable_mosaic.version = 11 : i64} {
  func.func @_residual_block_kernel(%arg0: i32, %arg1: memref<1x8x256xf32, #tpu.memory_space<vmem>>, %arg2: memref<8x72xf32, #tpu.memory_space<vmem>>, %arg3: memref<8x72xf32, #tpu.memory_space<vmem>>, %arg4: memref<1x8x256xf32, #tpu.memory_space<vmem>>, %arg5: memref<8x290xf32, #tpu.memory_space<vmem>>, %arg6: memref<72x256xf32, #tpu.memory_space<vmem>>) attributes {dimension_semantics = [#tpu.dimension_semantics<parallel>], iteration_bounds = array<i64: 2>, scalar_prefetch = 0 : i64, scratch_operands = 2 : i64, tpu.core_type = #tpu.core_type<tc>, window_params = [{transform_indices = @transform_0, window_bounds = array<i64: 1, 8, 256>}, {pipeline_mode = #tpu.pipeline_mode<synchronous>, transform_indices = @transform_1, window_bounds = array<i64: 8, 72>}, {pipeline_mode = #tpu.pipeline_mode<synchronous>, transform_indices = @transform_2, window_bounds = array<i64: 8, 72>}, {transform_indices = @transform_3, window_bounds = array<i64: 1, 8, 256>}]} {
    %0 = tpu.iota {dimensions = array<i32: 1>} : vector<8x256xi32>
    %c16_i32 = arith.constant 16 : i32
    %c0_i32 = arith.constant 0 : i32
    %1 = arith.cmpi eq, %c16_i32, %c0_i32 : i32
    %c1_i32 = arith.constant 1 : i32
    %2 = arith.select %1, %c1_i32, %c16_i32 : i32
    %3 = vector.broadcast %2 : i32 to vector<8x256xi32>
    %4 = arith.remsi %0, %3 : vector<8x256xi32>
    %c0_i32_0 = arith.constant 0 : i32
    %5 = vector.broadcast %c0_i32_0 : i32 to vector<8x256xi32>
    %6 = arith.cmpi ne, %4, %5 : vector<8x256xi32>
    %c0_i32_1 = arith.constant 0 : i32
    %7 = vector.broadcast %c0_i32_1 : i32 to vector<8x256xi32>
    %8 = arith.cmpi slt, %4, %7 : vector<8x256xi32>
    %c0_i32_2 = arith.constant 0 : i32
    %9 = arith.cmpi slt, %2, %c0_i32_2 : i32
    %10 = vector.broadcast %9 : i1 to vector<8x256xi1>
    %11 = vector.broadcast %10 : vector<8x256xi1> to vector<8x256xi1>
    %12 = arith.xori %8, %11 : vector<8x256xi1>
    %13 = arith.andi %12, %6 : vector<8x256xi1>
    %14 = vector.broadcast %2 : i32 to vector<8x256xi32>
    %15 = arith.addi %4, %14 : vector<8x256xi32>
    %16 = arith.select %13, %15, %4 : vector<8x256xi1>, vector<8x256xi32>
    %c0_i32_3 = arith.constant 0 : i32
    %17 = vector.broadcast %c0_i32_3 : i32 to vector<8x256xi32>
    %18 = arith.cmpi eq, %16, %17 : vector<8x256xi32>
    %c15_i32 = arith.constant 15 : i32
    %19 = vector.broadcast %c15_i32 : i32 to vector<8x256xi32>
    %20 = arith.cmpi eq, %16, %19 : vector<8x256xi32>
    %c0 = arith.constant 0 : index
    %c0_4 = arith.constant 0 : index
    %c0_5 = arith.constant 0 : index
    %21 = vector.load %arg1[%c0, %c0_4, %c0_5] : memref<1x8x256xf32, #tpu.memory_space<vmem>>, vector<1x8x256xf32>
    %22 = vector.shape_cast %21 : vector<1x8x256xf32> to vector<8x256xf32>
    %c0_6 = arith.constant 0 : index
    %c17 = arith.constant 17 : index
    %23 = vector.load %arg5[%c0_6, %c17] : memref<8x290xf32, #tpu.memory_space<vmem>>, vector<8x256xf32>
    tpu.vector_store %arg5[%c0_6, %c17], %22 {strides = array<i32>} : memref<8x290xf32, #tpu.memory_space<vmem>>, vector<8x256xf32>,
    %24 = vector.extract_strided_slice %22 {offsets = [0, 16], sizes = [8, 16], strides = [1, 1]} : vector<8x256xf32> to vector<8x16xf32>
    %c0_7 = arith.constant 0 : index
    %c1 = arith.constant 1 : index
    %25 = vector.load %arg5[%c0_7, %c1] : memref<8x290xf32, #tpu.memory_space<vmem>>, vector<8x16xf32>
    tpu.vector_store %arg5[%c0_7, %c1], %24 {strides = array<i32>} : memref<8x290xf32, #tpu.memory_space<vmem>>, vector<8x16xf32>,
    %26 = vector.extract_strided_slice %22 {offsets = [0, 224], sizes = [8, 16], strides = [1, 1]} : vector<8x256xf32> to vector<8x16xf32>
    %c0_8 = arith.constant 0 : index
    %c273 = arith.constant 273 : index
    %27 = vector.load %arg5[%c0_8, %c273] : memref<8x290xf32, #tpu.memory_space<vmem>>, vector<8x16xf32>
    tpu.vector_store %arg5[%c0_8, %c273], %26 {strides = array<i32>} : memref<8x290xf32, #tpu.memory_space<vmem>>, vector<8x16xf32>,
    %c0_9 = arith.constant 0 : index
    %c0_10 = arith.constant 0 : index
    %28 = vector.load %arg5[%c0_9, %c0_10] : memref<8x290xf32, #tpu.memory_space<vmem>>, vector<8x256xf32>
    %c0_11 = arith.constant 0 : index
    %c1_12 = arith.constant 1 : index
    %29 = vector.load %arg5[%c0_11, %c1_12] : memref<8x290xf32, #tpu.memory_space<vmem>>, vector<8x256xf32>
    %c0_13 = arith.constant 0 : index
    %c2 = arith.constant 2 : index
    %30 = vector.load %arg5[%c0_13, %c2] : memref<8x290xf32, #tpu.memory_space<vmem>>, vector<8x256xf32>
    %31 = arith.select %18, %30, %28 : vector<8x256xi1>, vector<8x256xf32>
    %c0_14 = arith.constant 0 : index
    %c0_15 = arith.constant 0 : index
    %32 = vector.load %arg6[%c0_14, %c0_15] : memref<72x256xf32, #tpu.memory_space<vmem>>, vector<8x256xf32>
    tpu.vector_store %arg6[%c0_14, %c0_15], %31 {strides = array<i32>} : memref<72x256xf32, #tpu.memory_space<vmem>>, vector<8x256xf32>,
    %c8 = arith.constant 8 : index
    %c0_16 = arith.constant 0 : index
    %33 = vector.load %arg6[%c8, %c0_16] : memref<72x256xf32, #tpu.memory_space<vmem>>, vector<8x256xf32>
    tpu.vector_store %arg6[%c8, %c0_16], %29 {strides = array<i32>} : memref<72x256xf32, #tpu.memory_space<vmem>>, vector<8x256xf32>,
    %34 = arith.select %20, %28, %30 : vector<8x256xi1>, vector<8x256xf32>
    %c16 = arith.constant 16 : index
    %c0_17 = arith.constant 0 : index
    %35 = vector.load %arg6[%c16, %c0_17] : memref<72x256xf32, #tpu.memory_space<vmem>>, vector<8x256xf32>
    tpu.vector_store %arg6[%c16, %c0_17], %34 {strides = array<i32>} : memref<72x256xf32, #tpu.memory_space<vmem>>, vector<8x256xf32>,
    %c0_18 = arith.constant 0 : index
    %c16_19 = arith.constant 16 : index
    %36 = vector.load %arg5[%c0_18, %c16_19] : memref<8x290xf32, #tpu.memory_space<vmem>>, vector<8x256xf32>
    %c0_20 = arith.constant 0 : index
    %c17_21 = arith.constant 17 : index
    %37 = vector.load %arg5[%c0_20, %c17_21] : memref<8x290xf32, #tpu.memory_space<vmem>>, vector<8x256xf32>
    %c0_22 = arith.constant 0 : index
    %c18 = arith.constant 18 : index
    %38 = vector.load %arg5[%c0_22, %c18] : memref<8x290xf32, #tpu.memory_space<vmem>>, vector<8x256xf32>
    %39 = arith.select %18, %38, %36 : vector<8x256xi1>, vector<8x256xf32>
    %c24 = arith.constant 24 : index
    %c0_23 = arith.constant 0 : index
    %40 = vector.load %arg6[%c24, %c0_23] : memref<72x256xf32, #tpu.memory_space<vmem>>, vector<8x256xf32>
    tpu.vector_store %arg6[%c24, %c0_23], %39 {strides = array<i32>} : memref<72x256xf32, #tpu.memory_space<vmem>>, vector<8x256xf32>,
    %c32 = arith.constant 32 : index
    %c0_24 = arith.constant 0 : index
    %41 = vector.load %arg6[%c32, %c0_24] : memref<72x256xf32, #tpu.memory_space<vmem>>, vector<8x256xf32>
    tpu.vector_store %arg6[%c32, %c0_24], %37 {strides = array<i32>} : memref<72x256xf32, #tpu.memory_space<vmem>>, vector<8x256xf32>,
    %42 = arith.select %20, %36, %38 : vector<8x256xi1>, vector<8x256xf32>
    %c40 = arith.constant 40 : index
    %c0_25 = arith.constant 0 : index
    %43 = vector.load %arg6[%c40, %c0_25] : memref<72x256xf32, #tpu.memory_space<vmem>>, vector<8x256xf32>
    tpu.vector_store %arg6[%c40, %c0_25], %42 {strides = array<i32>} : memref<72x256xf32, #tpu.memory_space<vmem>>, vector<8x256xf32>,
    %c0_26 = arith.constant 0 : index
    %c32_27 = arith.constant 32 : index
    %44 = vector.load %arg5[%c0_26, %c32_27] : memref<8x290xf32, #tpu.memory_space<vmem>>, vector<8x256xf32>
    %c0_28 = arith.constant 0 : index
    %c33 = arith.constant 33 : index
    %45 = vector.load %arg5[%c0_28, %c33] : memref<8x290xf32, #tpu.memory_space<vmem>>, vector<8x256xf32>
    %c0_29 = arith.constant 0 : index
    %c34 = arith.constant 34 : index
    %46 = vector.load %arg5[%c0_29, %c34] : memref<8x290xf32, #tpu.memory_space<vmem>>, vector<8x256xf32>
    %47 = arith.select %18, %46, %44 : vector<8x256xi1>, vector<8x256xf32>
    %c48 = arith.constant 48 : index
    %c0_30 = arith.constant 0 : index
    %48 = vector.load %arg6[%c48, %c0_30] : memref<72x256xf32, #tpu.memory_space<vmem>>, vector<8x256xf32>
    tpu.vector_store %arg6[%c48, %c0_30], %47 {strides = array<i32>} : memref<72x256xf32, #tpu.memory_space<vmem>>, vector<8x256xf32>,
    %c56 = arith.constant 56 : index
    %c0_31 = arith.constant 0 : index
    %49 = vector.load %arg6[%c56, %c0_31] : memref<72x256xf32, #tpu.memory_space<vmem>>, vector<8x256xf32>
    tpu.vector_store %arg6[%c56, %c0_31], %45 {strides = array<i32>} : memref<72x256xf32, #tpu.memory_space<vmem>>, vector<8x256xf32>,
    %50 = arith.select %20, %44, %46 : vector<8x256xi1>, vector<8x256xf32>
    %c64 = arith.constant 64 : index
    %c0_32 = arith.constant 0 : index
    %51 = vector.load %arg6[%c64, %c0_32] : memref<72x256xf32, #tpu.memory_space<vmem>>, vector<8x256xf32>
    tpu.vector_store %arg6[%c64, %c0_32], %50 {strides = array<i32>} : memref<72x256xf32, #tpu.memory_space<vmem>>, vector<8x256xf32>,
    %c0_33 = arith.constant 0 : index
    %c0_34 = arith.constant 0 : index
    %52 = vector.load %arg2[%c0_33, %c0_34] : memref<8x72xf32, #tpu.memory_space<vmem>>, vector<8x72xf32>
    %c0_35 = arith.constant 0 : index
    %c0_36 = arith.constant 0 : index
    %53 = vector.load %arg6[%c0_35, %c0_36] : memref<72x256xf32, #tpu.memory_space<vmem>>, vector<72x256xf32>
    %cst = arith.constant dense<0.000000e+00> : vector<8x256xf32>
    %54 = tpu.matmul %52, %53, %cst {dimension_numbers = #tpu.dot_dimension_numbers<[1], [0], [0], [1], [0, 0, 1, 1], [], []>} : vector<8x72xf32>, vector<72x256xf32>, vector<8x256xf32> -> vector<8x256xf32>
    %cst_37 = arith.constant dense<0.000000e+00> : vector<8xf32>
    %55 = vector.multi_reduction <add>, %54, %cst_37 [1] : vector<8x256xf32> to vector<8xf32>
    %56 = vector.shape_cast %55 : vector<8xf32> to vector<8x1xf32>
    %57 = arith.mulf %54, %54 : vector<8x256xf32>
    %cst_38 = arith.constant dense<0.000000e+00> : vector<8xf32>
    %58 = vector.multi_reduction <add>, %57, %cst_38 [1] : vector<8x256xf32> to vector<8xf32>
    %59 = vector.shape_cast %58 : vector<8xf32> to vector<8x1xf32>
    %cst_39 = arith.constant 3.906250e-03 : f32
    %60 = vector.broadcast %cst_39 : f32 to vector<8x1xf32>
    %61 = arith.mulf %56, %60 : vector<8x1xf32>
    %cst_40 = arith.constant 3.906250e-03 : f32
    %62 = vector.broadcast %cst_40 : f32 to vector<8x1xf32>
    %63 = arith.mulf %59, %62 : vector<8x1xf32>
    %64 = arith.mulf %61, %61 : vector<8x1xf32>
    %65 = arith.subf %63, %64 : vector<8x1xf32>
    %66 = vector.broadcast %61 : vector<8x1xf32> to vector<8x256xf32>
    %67 = arith.subf %54, %66 : vector<8x256xf32>
    %cst_41 = arith.constant 9.99999974E-6 : f32
    %68 = vector.broadcast %cst_41 : f32 to vector<8x1xf32>
    %69 = arith.addf %65, %68 : vector<8x1xf32>
    %70 = math.rsqrt %69 : vector<8x1xf32>
    %71 = vector.broadcast %70 : vector<8x1xf32> to vector<8x256xf32>
    %72 = arith.mulf %67, %71 : vector<8x256xf32>
    %cst_42 = arith.constant 0.000000e+00 : f32
    %73 = vector.broadcast %cst_42 : f32 to vector<8x256xf32>
    %74 = arith.maximumf %72, %73 : vector<8x256xf32>
    %c0_43 = arith.constant 0 : index
    %c17_44 = arith.constant 17 : index
    %75 = vector.load %arg5[%c0_43, %c17_44] : memref<8x290xf32, #tpu.memory_space<vmem>>, vector<8x256xf32>
    tpu.vector_store %arg5[%c0_43, %c17_44], %74 {strides = array<i32>} : memref<8x290xf32, #tpu.memory_space<vmem>>, vector<8x256xf32>,
    %76 = vector.extract_strided_slice %74 {offsets = [0, 16], sizes = [8, 16], strides = [1, 1]} : vector<8x256xf32> to vector<8x16xf32>
    %c0_45 = arith.constant 0 : index
    %c1_46 = arith.constant 1 : index
    %77 = vector.load %arg5[%c0_45, %c1_46] : memref<8x290xf32, #tpu.memory_space<vmem>>, vector<8x16xf32>
    tpu.vector_store %arg5[%c0_45, %c1_46], %76 {strides = array<i32>} : memref<8x290xf32, #tpu.memory_space<vmem>>, vector<8x16xf32>,
    %78 = vector.extract_strided_slice %74 {offsets = [0, 224], sizes = [8, 16], strides = [1, 1]} : vector<8x256xf32> to vector<8x16xf32>
    %c0_47 = arith.constant 0 : index
    %c273_48 = arith.constant 273 : index
    %79 = vector.load %arg5[%c0_47, %c273_48] : memref<8x290xf32, #tpu.memory_space<vmem>>, vector<8x16xf32>
    tpu.vector_store %arg5[%c0_47, %c273_48], %78 {strides = array<i32>} : memref<8x290xf32, #tpu.memory_space<vmem>>, vector<8x16xf32>,
    %c0_49 = arith.constant 0 : index
    %c0_50 = arith.constant 0 : index
    %80 = vector.load %arg5[%c0_49, %c0_50] : memref<8x290xf32, #tpu.memory_space<vmem>>, vector<8x256xf32>
    %c0_51 = arith.constant 0 : index
    %c1_52 = arith.constant 1 : index
    %81 = vector.load %arg5[%c0_51, %c1_52] : memref<8x290xf32, #tpu.memory_space<vmem>>, vector<8x256xf32>
    %c0_53 = arith.constant 0 : index
    %c2_54 = arith.constant 2 : index
    %82 = vector.load %arg5[%c0_53, %c2_54] : memref<8x290xf32, #tpu.memory_space<vmem>>, vector<8x256xf32>
    %83 = arith.select %18, %82, %80 : vector<8x256xi1>, vector<8x256xf32>
    %c0_55 = arith.constant 0 : index
    %c0_56 = arith.constant 0 : index
    %84 = vector.load %arg6[%c0_55, %c0_56] : memref<72x256xf32, #tpu.memory_space<vmem>>, vector<8x256xf32>
    tpu.vector_store %arg6[%c0_55, %c0_56], %83 {strides = array<i32>} : memref<72x256xf32, #tpu.memory_space<vmem>>, vector<8x256xf32>,
    %c8_57 = arith.constant 8 : index
    %c0_58 = arith.constant 0 : index
    %85 = vector.load %arg6[%c8_57, %c0_58] : memref<72x256xf32, #tpu.memory_space<vmem>>, vector<8x256xf32>
    tpu.vector_store %arg6[%c8_57, %c0_58], %81 {strides = array<i32>} : memref<72x256xf32, #tpu.memory_space<vmem>>, vector<8x256xf32>,
    %86 = arith.select %20, %80, %82 : vector<8x256xi1>, vector<8x256xf32>
    %c16_59 = arith.constant 16 : index
    %c0_60 = arith.constant 0 : index
    %87 = vector.load %arg6[%c16_59, %c0_60] : memref<72x256xf32, #tpu.memory_space<vmem>>, vector<8x256xf32>
    tpu.vector_store %arg6[%c16_59, %c0_60], %86 {strides = array<i32>} : memref<72x256xf32, #tpu.memory_space<vmem>>, vector<8x256xf32>,
    %c0_61 = arith.constant 0 : index
    %c16_62 = arith.constant 16 : index
    %88 = vector.load %arg5[%c0_61, %c16_62] : memref<8x290xf32, #tpu.memory_space<vmem>>, vector<8x256xf32>
    %c0_63 = arith.constant 0 : index
    %c17_64 = arith.constant 17 : index
    %89 = vector.load %arg5[%c0_63, %c17_64] : memref<8x290xf32, #tpu.memory_space<vmem>>, vector<8x256xf32>
    %c0_65 = arith.constant 0 : index
    %c18_66 = arith.constant 18 : index
    %90 = vector.load %arg5[%c0_65, %c18_66] : memref<8x290xf32, #tpu.memory_space<vmem>>, vector<8x256xf32>
    %91 = arith.select %18, %90, %88 : vector<8x256xi1>, vector<8x256xf32>
    %c24_67 = arith.constant 24 : index
    %c0_68 = arith.constant 0 : index
    %92 = vector.load %arg6[%c24_67, %c0_68] : memref<72x256xf32, #tpu.memory_space<vmem>>, vector<8x256xf32>
    tpu.vector_store %arg6[%c24_67, %c0_68], %91 {strides = array<i32>} : memref<72x256xf32, #tpu.memory_space<vmem>>, vector<8x256xf32>,
    %c32_69 = arith.constant 32 : index
    %c0_70 = arith.constant 0 : index
    %93 = vector.load %arg6[%c32_69, %c0_70] : memref<72x256xf32, #tpu.memory_space<vmem>>, vector<8x256xf32>
    tpu.vector_store %arg6[%c32_69, %c0_70], %89 {strides = array<i32>} : memref<72x256xf32, #tpu.memory_space<vmem>>, vector<8x256xf32>,
    %94 = arith.select %20, %88, %90 : vector<8x256xi1>, vector<8x256xf32>
    %c40_71 = arith.constant 40 : index
    %c0_72 = arith.constant 0 : index
    %95 = vector.load %arg6[%c40_71, %c0_72] : memref<72x256xf32, #tpu.memory_space<vmem>>, vector<8x256xf32>
    tpu.vector_store %arg6[%c40_71, %c0_72], %94 {strides = array<i32>} : memref<72x256xf32, #tpu.memory_space<vmem>>, vector<8x256xf32>,
    %c0_73 = arith.constant 0 : index
    %c32_74 = arith.constant 32 : index
    %96 = vector.load %arg5[%c0_73, %c32_74] : memref<8x290xf32, #tpu.memory_space<vmem>>, vector<8x256xf32>
    %c0_75 = arith.constant 0 : index
    %c33_76 = arith.constant 33 : index
    %97 = vector.load %arg5[%c0_75, %c33_76] : memref<8x290xf32, #tpu.memory_space<vmem>>, vector<8x256xf32>
    %c0_77 = arith.constant 0 : index
    %c34_78 = arith.constant 34 : index
    %98 = vector.load %arg5[%c0_77, %c34_78] : memref<8x290xf32, #tpu.memory_space<vmem>>, vector<8x256xf32>
    %99 = arith.select %18, %98, %96 : vector<8x256xi1>, vector<8x256xf32>
    %c48_79 = arith.constant 48 : index
    %c0_80 = arith.constant 0 : index
    %100 = vector.load %arg6[%c48_79, %c0_80] : memref<72x256xf32, #tpu.memory_space<vmem>>, vector<8x256xf32>
    tpu.vector_store %arg6[%c48_79, %c0_80], %99 {strides = array<i32>} : memref<72x256xf32, #tpu.memory_space<vmem>>, vector<8x256xf32>,
    %c56_81 = arith.constant 56 : index
    %c0_82 = arith.constant 0 : index
    %101 = vector.load %arg6[%c56_81, %c0_82] : memref<72x256xf32, #tpu.memory_space<vmem>>, vector<8x256xf32>
    tpu.vector_store %arg6[%c56_81, %c0_82], %97 {strides = array<i32>} : memref<72x256xf32, #tpu.memory_space<vmem>>, vector<8x256xf32>,
    %102 = arith.select %20, %96, %98 : vector<8x256xi1>, vector<8x256xf32>
    %c64_83 = arith.constant 64 : index
    %c0_84 = arith.constant 0 : index
    %103 = vector.load %arg6[%c64_83, %c0_84] : memref<72x256xf32, #tpu.memory_space<vmem>>, vector<8x256xf32>
    tpu.vector_store %arg6[%c64_83, %c0_84], %102 {strides = array<i32>} : memref<72x256xf32, #tpu.memory_space<vmem>>, vector<8x256xf32>,
    %c0_85 = arith.constant 0 : index
    %c0_86 = arith.constant 0 : index
    %104 = vector.load %arg3[%c0_85, %c0_86] : memref<8x72xf32, #tpu.memory_space<vmem>>, vector<8x72xf32>
    %c0_87 = arith.constant 0 : index
    %c0_88 = arith.constant 0 : index
    %105 = vector.load %arg6[%c0_87, %c0_88] : memref<72x256xf32, #tpu.memory_space<vmem>>, vector<72x256xf32>
    %cst_89 = arith.constant dense<0.000000e+00> : vector<8x256xf32>
    %106 = tpu.matmul %104, %105, %cst_89 {dimension_numbers = #tpu.dot_dimension_numbers<[1], [0], [0], [1], [0, 0, 1, 1], [], []>} : vector<8x72xf32>, vector<72x256xf32>, vector<8x256xf32> -> vector<8x256xf32>
    %cst_90 = arith.constant dense<0.000000e+00> : vector<8xf32>
    %107 = vector.multi_reduction <add>, %106, %cst_90 [1] : vector<8x256xf32> to vector<8xf32>
    %108 = vector.shape_cast %107 : vector<8xf32> to vector<8x1xf32>
    %109 = arith.mulf %106, %106 : vector<8x256xf32>
    %cst_91 = arith.constant dense<0.000000e+00> : vector<8xf32>
    %110 = vector.multi_reduction <add>, %109, %cst_91 [1] : vector<8x256xf32> to vector<8xf32>
    %111 = vector.shape_cast %110 : vector<8xf32> to vector<8x1xf32>
    %cst_92 = arith.constant 3.906250e-03 : f32
    %112 = vector.broadcast %cst_92 : f32 to vector<8x1xf32>
    %113 = arith.mulf %108, %112 : vector<8x1xf32>
    %cst_93 = arith.constant 3.906250e-03 : f32
    %114 = vector.broadcast %cst_93 : f32 to vector<8x1xf32>
    %115 = arith.mulf %111, %114 : vector<8x1xf32>
    %116 = arith.mulf %113, %113 : vector<8x1xf32>
    %117 = arith.subf %115, %116 : vector<8x1xf32>
    %118 = vector.broadcast %113 : vector<8x1xf32> to vector<8x256xf32>
    %119 = arith.subf %106, %118 : vector<8x256xf32>
    %cst_94 = arith.constant 9.99999974E-6 : f32
    %120 = vector.broadcast %cst_94 : f32 to vector<8x1xf32>
    %121 = arith.addf %117, %120 : vector<8x1xf32>
    %122 = math.rsqrt %121 : vector<8x1xf32>
    %123 = vector.broadcast %122 : vector<8x1xf32> to vector<8x256xf32>
    %124 = arith.mulf %119, %123 : vector<8x256xf32>
    %125 = arith.addf %124, %22 : vector<8x256xf32>
    %c0_95 = arith.constant 0 : index
    %c0_96 = arith.constant 0 : index
    %c0_97 = arith.constant 0 : index
    %126 = vector.load %arg4[%c0_95, %c0_96, %c0_97] : memref<1x8x256xf32, #tpu.memory_space<vmem>>, vector<1x8x256xf32>
    %127 = vector.shape_cast %126 : vector<1x8x256xf32> to vector<8x256xf32>
    %128 = vector.shape_cast %125 : vector<8x256xf32> to vector<1x8x256xf32>
    tpu.vector_store %arg4[%c0_95, %c0_96, %c0_97], %128 {strides = array<i32>} : memref<1x8x256xf32, #tpu.memory_space<vmem>>, vector<1x8x256xf32>,
    return
  }
  func.func @transform_0(%arg0: i32) -> (i32, i32, i32) {
    %c0_i32 = arith.constant 0 : i32
    %c0_i32_0 = arith.constant 0 : i32
    %c0_i32_1 = arith.constant 0 : i32
    return %arg0, %c0_i32, %c0_i32_0 : i32, i32, i32
  }
  func.func @transform_1(%arg0: i32) -> (i32, i32) {
    %c0_i32 = arith.constant 0 : i32
    %c0_i32_0 = arith.constant 0 : i32
    %c0_i32_1 = arith.constant 0 : i32
    return %c0_i32, %c0_i32_0 : i32, i32
  }
  func.func @transform_2(%arg0: i32) -> (i32, i32) {
    %c0_i32 = arith.constant 0 : i32
    %c0_i32_0 = arith.constant 0 : i32
    %c0_i32_1 = arith.constant 0 : i32
    return %c0_i32, %c0_i32_0 : i32, i32
  }
  func.func @transform_3(%arg0: i32) -> (i32, i32, i32) {
    %c0_i32 = arith.constant 0 : i32
    %c0_i32_0 = arith.constant 0 : i32
    %c0_i32_1 = arith.constant 0 : i32
    return %arg0, %c0_i32, %c0_i32_0 : i32, i32, i32
  }
}

</mosaic_0001>

<bundles_post_ra>
// kernel: tpu_custom_call.1
= control target key start
LH: loop header
LB: loop body
LE: loop exit
PB: predicated region body
PF: predicated region fallthrough
CT: control target
= control target key end

     0   :  { %8 = vsyncpa [#allocation5], 0  ;;  %s1689_s0 = inlined_call_operand.hbm [shape: f32[2,8,256], index: 0, kind: input, shape index: {}]   ;;  %s1690_s1 = inlined_call_operand.hbm [shape: f32[8,72], index: 1, kind: input, shape index: {}]   ;;  %s1691_s2 = inlined_call_operand.hbm [shape: f32[8,72], index: 2, kind: input, shape index: {}]   ;;  %s1692_s3 = inlined_call_operand.hbm [shape: f32[2,8,256], index: 3, kind: output, shape index: {}]  }
   0x1   :  { %10 = vsyncpa [#allocation5 + $0x1], 0 }
   0x2   :  { %11 = vsyncpa [#allocation8], 0 }
   0x3   :  { %12 = vsyncpa [#allocation6], 0 }
   0x4   :  { %14 = vsyncpa [#allocation6 + $0x1], 0  ;;  %s1279_s12 = smov 0   ;;  %s1281_s13 = smov 0  }
   0x5   :  { %s1283_s14 = smov 0   ;;  %s1285_s15 = smov 0  }
   0x6 LB: > { %s1300_s16 = sadd.s32 4294967295, %s1241_s15   ;;  %s888_s17 = sadd.s32 4294967294, %s1241_s15   ;;  %s1241_s15 = sphi %s1285_s15, %s1723_s15   ;;  %s1237_s14 = sphi %s1283_s14, %s1722_s14   ;;  %s1233_s13 = sphi %s1281_s13, %s1721_s13   ;;  %s1229_s12 = sphi %s1279_s12, %s1720_s12  }
   0x7   : > { %p40_p0 = scmp.ne.s32.totalorder %s1233_s13, %s1229_s12  ;;  %p1693_p1 = scmp.eq.s32.totalorder %s1300_s16, 0 }
   0x8   : > { %p112_p3 = scmp.eq.s32.totalorder %s888_s17, 1  ;;  %p889_p5 = scmp.ge.s32.totalorder %s1241_s15, 1 }
   0x9   : > { %p1309_p4 = por %p1693_p1, %p40_p0  ;;  %p119_p7 = scmp.lt.s32.totalorder %s1241_s15, 3 }
   0xa   : > { %p1314_p6 = por %p112_p3, %p40_p0  ;;  %s1243_s21 = smov [#allocation7]  }
   0xb   : > { %s1697_s18 = scalar_select %p1309_p4, 1, 0 }
   0xc   : > { %s1698_s19 = scalar_select %p1314_p6, 1, 0 }
   0xd   : > { %p1319_p8 = pnand %p889_p5, %p119_p7  ;;  %s132_s22 = sshll.u32 %s1243_s21, 4  ;;  %s133_s22 = int_to_ptr.vmem [resolvable:$true] %s132_s22 }
   0xe   : > { %s1244_s23 = smov [#allocation9]   ;;  %s1335_s26 = sadd.s32 1, %s1241_s15  }
   0xf   : > { %s1699_s20 = scalar_select %p1319_p8, 1, 0 }
  0x10   : > { %p954_p10 = pneg %p1319_p8  ;;  %s143_s24 = sshll.u32 %s1244_s23, 4  ;;  %s1332_s24 = int_to_ptr.vmem [resolvable:$true] %s143_s24 }
  0x11   : > { %s24_s27 = ssub.s32 %s1241_s15, %s1335_s26  ;;  %s1085_s30 = scalar_lea.hbm %s1690_s1, 128 }
  0x12   : > { %p1328_p11 = pnand %p954_p10, %p1693_p1  ;;  %p1086_p12 = scmp.ne.s32.totalorder %s1690_s1, %s1085_s30 }
  0x13   : > { %p1092_p5 = scmp.lt.u32.totalorder %s1085_s30, %s1690_s1 }
  0x14   : > { %p1087_p13 = pneg %p1328_p11 }
  0x16   : > { %p1088_p0 = pnand %p1087_p13, %p1086_p12 }
  0x18   : > { %p1089_p3 = pneg %p1088_p0 }
  0x1a   : > { %p1094_p7 = pnand %p1092_p5, %p1089_p3 }
  0x1c   : > { %1097 = shalt.err (!%p1094_p7)
}
  0x1d   : > { %s1098_s8 = scalar_lea.vmem %s133_s22, 128  ;;  %p1106_p2 = scmp.lt.s32.totalorder %s133_s22, %s133_s22 }
  0x1e   : > { %p1099_p10 = scmp.ne.s32.totalorder %s133_s22, %s1098_s8  ;;  %p1107_p6 = scmp.lt.s32.totalorder %s1098_s8, %s1098_s8 }
  0x20   : > { %p1101_p9 = pnand %p1099_p10, %p1087_p13  ;;  %p1108_p4 = por %p1107_p6, %p1106_p2 }
  0x22   : > { %p1102_p1 = pneg %p1101_p9 }
  0x24   : > { %p1109_p8 = pnand %p1108_p4, %p1102_p1 }
  0x26   : > { %1112 = shalt.err (!%p1109_p8)
}
  0x27   : > { %957 = dma.hbm_to_vmem [thread:$0]  (!%p1328_p11), %s1690_s1, 128, %s133_s22, [#allocation8]  }
  0x28   : > { %s1113_s21 = scalar_lea.hbm %s1691_s2, 128 }
  0x29   : > { %p1114_p9 = scmp.ne.s32.totalorder %s1691_s2, %s1113_s21  ;;  %p1120_p4 = scmp.lt.u32.totalorder %s1113_s21, %s1691_s2 }
  0x2b   : > { %p1116_p2 = pnand %p1114_p9, %p1087_p13 }
  0x2d   : > { %p1117_p1 = pneg %p1116_p2 }
  0x2f   : > { %p1122_p6 = pnand %p1120_p4, %p1117_p1 }
  0x31   : > { %1125 = shalt.err (!%p1122_p6)
}
  0x32   : > { %s1126_s22 = scalar_lea.vmem %s1332_s24, 128  ;;  %p1134_p3 = scmp.lt.s32.totalorder %s1332_s24, %s1332_s24 }
  0x33   : > { %p1127_p8 = scmp.ne.s32.totalorder %s1332_s24, %s1126_s22  ;;  %p1135_p5 = scmp.lt.s32.totalorder %s1126_s22, %s1126_s22 }
  0x35   : > { %p1129_p12 = pnand %p1127_p8, %p1087_p13  ;;  %p1136_p7 = por %p1135_p5, %p1134_p3 }
  0x37   : > { %p1130_p0 = pneg %p1129_p12 }
  0x39   : > { %p1137_p10 = pnand %p1136_p7, %p1130_p0 }
  0x3b   : > { %1140 = shalt.err (!%p1137_p10)
}
  0x3c   : > { %960 = dma.hbm_to_vmem [thread:$0]  (!%p1328_p11), %s1691_s2, 128, %s1332_s24, [#allocation8]  }
  0x3d   : > { %p25_p13 = scmp.eq.s32.totalorder %s24_s27, 0  ;;  %s27_s6 = sadd.s32 1, %s1237_s14 }
  0x3e   : > { %p34_p9 = scmp.ne.s32.totalorder %s1237_s14, %s1233_s13  ;;  %p35_p2 = scmp.eq.s32.totalorder %s1241_s15, 0 }
  0x3f   : > { %s1394_s25 = scalar_select %p25_p13, %s1237_s14, %s27_s6  }
  0x40   : > { %p36_p1 = por %p35_p2, %p34_p9  ;;  %p1701_p4 = scmp.eq.s32.totalorder %s1300_s16, 1 }
  0x41   : > { %p971_p8 = scmp.lt.s32.totalorder %s1241_s15, 2  ;;  %s154_s8 = sand.u32 1, %s1237_s14  }
  0x42   : > { %p1398_p6 = por %p1701_p4, %p34_p9  ;;  %s893_s9 = sshll.u32 %s154_s8, 4 }
  0x43   : > { %s908_s10 = sshll.u32 %s1241_s15, 8  ;;  %s158_s27 = scalar_lea.vmem [#allocation4], %s893_s9 }
  0x44   : > { %s1408_s24 = scalar_lea.hbm %s1689_s0, %s908_s10  ;;  %s166_s21 = sshll.u32 %s158_s27, 4  ;;  %s1410_s21 = int_to_ptr.vmem [resolvable:$true] %s166_s21 }
  0x45   : > { %p1412_p11 = pnand %p971_p8, %p36_p1  ;;  %s155_s28 = scalar_lea.sflag [#allocation5], %s154_s8 }
  0x46   : > { %s1141_s29 = scalar_lea.hbm %s1408_s24, 256  ;;  %s1146_s4 = scalar_lea.hbm %s1689_s0, 512 }
  0x47   : > { %p1142_p12 = scmp.ne.s32.totalorder %s1408_s24, %s1141_s29  ;;  %p1143_p0 = pneg %p1412_p11 }
  0x48   : > { %p1147_p7 = scmp.lt.u32.totalorder %s1408_s24, %s1689_s0  ;;  %p1148_p10 = scmp.lt.u32.totalorder %s1146_s4, %s1141_s29 }
  0x49   : > { %p1144_p3 = pnand %p1143_p0, %p1142_p12  ;;  %p1150_p9 = scmp.lt.u32.totalorder %s1141_s29, %s1408_s24 }
  0x4a   : > { %p1149_p13 = por %p1148_p10, %p1147_p7 }
  0x4b   : > { %p1145_p5 = pneg %p1144_p3 }
  0x4c   : > { %p1151_p2 = por %p1150_p9, %p1149_p13 }
  0x4e   : > { %p1152_p1 = pnand %p1151_p2, %p1145_p5 }
  0x50   : > { %1155 = shalt.err (!%p1152_p1)
}
  0x51   : > { %s1156_s8 = scalar_lea.vmem %s1410_s21, 256  ;;  %s1245_s9 = smov [#allocation4]  }
  0x52   : > { %p1157_p4 = scmp.ne.s32.totalorder %s1410_s21, %s1156_s8  ;;  %s1161_s10 = sshll.u32 %s1245_s9, 4  ;;  %s1162_s10 = int_to_ptr.vmem [resolvable:$false] %s1161_s10 }
  0x53   : > { %s1163_s11 = scalar_lea.vmem %s1162_s10, 512  ;;  %p1164_p3 = scmp.lt.s32.totalorder %s1410_s21, %s1162_s10 }
  0x54   : > { %p1159_p8 = pnand %p1157_p4, %p1143_p0  ;;  %p1165_p7 = scmp.lt.s32.totalorder %s1163_s11, %s1156_s8 }
  0x56   : > { %p1160_p12 = pneg %p1159_p8  ;;  %p1166_p10 = por %p1165_p7, %p1164_p3 }
  0x58   : > { %p1167_p13 = pnand %p1166_p10, %p1160_p12 }
  0x5a   : > { %1170 = shalt.err (!%p1167_p13)
}
  0x5b   : > { %964 = dma.hbm_to_vmem [thread:$0]  (!%p1412_p11), %s1408_s24, 256, %s1410_s21, %s155_s28  }
  0x5c   : > { %p1704_p5 = scmp.ne.s32.totalorder %s1699_s20, 0 }
  0x5d   : > { %s1444_s17 = sand.u32 (!%p1704_p5), 1, %s1233_s13   ;;  %p1705_p0 = scmp.ne.s32.totalorder (!%p1704_p5), %s1697_s18, 0 }
  0x5e   : > { %175 = sbr.rel (%p1704_p5) target bundleno = 1457 (0x5b1), region = 32  ;;  %s897_s27 = sshll.u32 (!%p1704_p5), %s1444_s17, 4 }
  0x5f   : > { %s178_s29 = scalar_lea.sflag (!%p1704_p5), [#allocation5], %s1444_s17  ;;  %s181_s30 = scalar_lea.vmem (!%p1704_p5), [#allocation4], %s897_s27 }
  0x65   : > { %1216 = dma.done.wait (%p1705_p0), %s178_s29, 256  }
  0x66   : > { %1218 = vsyncadd (%p1705_p0), %s178_s29, 4294967040  ;;  %p1706_p11 = scmp.eq.s32.totalorder %s1300_s16, 0 }
  0x68   : > { %1220 = dma.done.wait (%p1706_p11), [#allocation8], 256   ;;  %p1707_p9 = pmov %p1706_p11 }
  0x69   : > { %v1458_v0 = vld [vmem:[%s181_s30 + $0x8] sm:$0xff]  ;;  %v1460_v1 = vld [vmem:[%s181_s30] sm:$0xff]  ;;  %s1246_s20 = smov 49   ;;  %s1247_s24 = smov 17   ;;  %vm256_vm0 = vcmask 1047688   ;;  %vm263_vm1 = vcmask 138248   ;;  %v212_v11 = vlaneseq }
  0x6a   : > { %1222 = vsyncadd (%p1707_p9), [#allocation8], 4294967040  ;;  %265 = vrot.lane.b32.xlu1 %v1458_v0, %s1246_s20  ;;  %247 = vrot.lane.b32.xlu0 %v1460_v1, %s1247_s24  ;;  %s1248_s18 = smov 113   ;;  %vm251_vm2 = vcmask 138240   ;;  %vm268_vm3 = vcmask 269448   ;;  %s1249_s21 = smov 126  }
  0x6b   : > { %s1250_s23 = smov 127   ;;  %s1251_s28 = smov 112   ;;  %v1257_v10 = vmov 0.0   ;;  %v213_v12 = vand.u32 127, %v212_v11  ;;  %vm282_vm4 = vcmask 1031168   ;;  %vm297_vm7 = vcmask 1039360  }
  0x6c   : > { %s1252_s22 = smov 110   ;;  %s1253_s4 = smov 111   ;;  %493 = vmatprep.mubr.f32.mxu0 %v1257_v10  ;;  %755 = vmatprep.mubr.f32.mxu1 %v1257_v10  ;;  %vm331_vm8 = vcmask 916480   ;;  %vm320_vm9 = vcmask 900096   ;;  %vm346_vm12 = vcmask 908288   ;;  %vm380_vm13 = vcmask 785408  }
  0x6d   : > { %s1254_s5 = smov 94   ;;  %s1255_s6 = smov 96   ;;  %v214_v13 = vadd.s32 128, %v213_v12  ;;  %v219_v16 = vand.u32 15, %v213_v12  ;;  %vm1696_vm14 = vcmask 769024   ;;  %vm395_vm15 = vcmask 777216  }
  0x6e   : > { %260 = vrot.lane.b32.xlu1 %v1460_v1, %s1248_s18  ;;  %249 = vrot.lane.b32.xlu0 %v1458_v0, %s1247_s24  ;;  %s1256_s8 = smov 95   ;;  %s909_s9 = sshll.u32 %s1300_s16, 8 }
  0x6f   : > { %v226_v15 = vand.u32 15, %v214_v13  ;;  %vm1513_vm6 = vcmp.eq.s32.totalorder %v219_v16, 0  ;;  %vm1530_vm11 = vcmp.eq.s32.totalorder %v219_v16, 15  ;;  %s211_s10 = scalar_lea.vmem [#allocation10], %s897_s27  ;;  %s785_s16 = scalar_lea.sflag [#allocation6], %s1444_s17 }
  0x70   : > { %s799_s11 = sshll.u32 %s211_s10, 4  ;;  %s1647_s11 = int_to_ptr.vmem [resolvable:$true] %s799_s11 }
  0x71   : > { %vm1508_vm5 = vcmp.eq.s32.totalorder %v226_v15, 0  ;;  %vm1526_vm10 = vcmp.eq.s32.totalorder %v226_v15, 15  ;;  %s1171_s27 = scalar_lea.vmem %s1647_s11, 256 }
  0x72   : > { %p1172_p2 = scmp.ne.s32.totalorder %s1647_s11, %s1171_s27 }
  0x74   : > { %p1173_p1 = pnand %p1172_p2, %p1398_p6 }
  0x76   : > { %p1174_p4 = pneg %p1173_p1 }
  0xdc   : > { %v266_v2 = vpop.permute.xlu1 %265  ;;  %v248_v3 = vpop.permute.xlu0 %247 }
  0xdd   : > { %257 = vst.msk [vmem:[#allocation2] sm:$0xff] %vm256_vm0, %v248_v3 }
  0xe0   : > { %v261_v4 = vpop.permute.xlu1 %260  ;;  %v250_v5 = vpop.permute.xlu0 %249 }
  0xe1   : > { %264 = vst.msk [vmem:[#allocation2] sm:$0xff] %vm263_vm1, %v261_v4  ;;  %v1477_v7 = vsel %vm251_vm2, %v248_v3, %v250_v5 }
  0xe2   : > { %259 = vst.msk [vmem:[#allocation2 + $0x10] sm:$0xff] %vm251_vm2, %v250_v5 }
  0xe3   : > { %269 = vst.msk [vmem:[#allocation2 + $0x10] sm:$0xff] %vm268_vm3, %v266_v2 }
  0xe8   : > { %v1474_v6 = vld [vmem:[#allocation2] sm:$0xff] }
  0xe9   : > { %276 = vrot.lane.b32.xlu1 %v1474_v6, %s1249_s21 }
  0xea   : > { %v272_v8 = vld [vmem:[#allocation2 + $0x10] sm:$0xff] }
  0xeb   : > { %v1021_v9 = vpack.i.bf16 %v272_v8, %v1477_v7 }
  0xed   : > { %1022 = vrot.lane.b32.xlu0 %v1021_v9, %s1249_s21  ;;  %291 = vrot.lane.b32.xlu1 %v1474_v6, %s1250_s23 }
  0xf1   : > { %1027 = vrot.lane.b32.xlu0 %v1021_v9, %s1250_s23  ;;  %1037 = vrot.lane.b32.xlu1 %v1021_v9, %s1251_s28 }
  0xf5   : > { %1032 = vrot.lane.b32.xlu0 %v1021_v9, %s1252_s22  ;;  %325 = vrot.lane.b32.xlu1 %v1474_v6, %s1251_s28 }
  0xf9   : > { %314 = vrot.lane.b32.xlu0 %v1474_v6, %s1252_s22  ;;  %340 = vrot.lane.b32.xlu1 %v1474_v6, %s1253_s4 }
  0xfd   : > { %1042 = vrot.lane.b32.xlu0 %v1021_v9, %s1253_s4  ;;  %367 = vrot.lane.b32.xlu1 %v272_v8, %s1254_s5 }
 0x101   : > { %365 = vrot.lane.b32.xlu0 %v1477_v7, %s1254_s5  ;;  %378 = vrot.lane.b32.xlu1 %v272_v8, %s1255_s6 }
 0x105   : > { %376 = vrot.lane.b32.xlu0 %v1477_v7, %s1255_s6  ;;  %374 = vrot.lane.b32.xlu1 %v1474_v6, %s1255_s6 }
 0x109   : > { %363 = vrot.lane.b32.xlu0 %v1474_v6, %s1254_s5  ;;  %389 = vrot.lane.b32.xlu1 %v1474_v6, %s1256_s8 }
 0x10d   : > { %1047 = vrot.lane.b32.xlu0 %v1021_v9, %s1256_s8 }
 0x15b   : > { %v277_v14 = vpop.permute.xlu1 %276 }
 0x15f   : > { %v1023_v17 = vpop.permute.xlu0 %1022  ;;  %v292_v20 = vpop.permute.xlu1 %291 }
 0x160   : > { %v1025_v18 = vunpack.i.h.bf16 %v1023_v17  ;;  %v1024_v19 = vunpack.i.l.bf16 %v1023_v17 }
 0x162   : > { %v284_v22 = vsel %vm282_vm4, %v1024_v19, %v1025_v18  ;;  %v283_v24 = vsel %vm282_vm4, %v277_v14, %v1024_v19 }
 0x163   : > { %v1028_v25 = vpop.permute.xlu0 %1027  ;;  %v1038_v28 = vpop.permute.xlu1 %1037  ;;  %v288_v29 = vsel %vm1508_vm5, %v284_v22, %v1477_v7  ;;  %v287_v30 = vsel %vm1513_vm6, %v283_v24, %v1474_v6  ;;  %v305_v46 = vsel %vm1526_vm10, %v1477_v7, %v284_v22  ;;  %v304_v53 = vsel %vm1530_vm11, %v1474_v6, %v283_v24 }
 0x164   : > { %v1030_v26 = vunpack.i.h.bf16 %v1028_v25  ;;  %v1029_v27 = vunpack.i.l.bf16 %v1028_v25  ;;  %v1040_v31 = vunpack.i.h.bf16 %v1038_v28  ;;  %v1039_v32 = vunpack.i.l.bf16 %v1038_v28  ;;  %v406_v25 = vld [vmem:[#allocation7] sm:$0xff] }
 0x166   : > { %v299_v33 = vsel %vm297_vm7, %v1029_v27, %v1030_v26  ;;  %v298_v34 = vsel %vm297_vm7, %v292_v20, %v1029_v27  ;;  %v333_v44 = vsel %vm331_vm8, %v1039_v32, %v1040_v31 }
 0x167   : > { %v1033_v35 = vpop.permute.xlu0 %1032  ;;  %v910_v36 = vpack.c.bf16 %v299_v33, %v288_v29  ;;  %v912_v37 = vpack.c.bf16 %v298_v34, %v287_v30  ;;  %v326_v40 = vpop.permute.xlu1 %325 }
 0x168   : > { %v1035_v38 = vunpack.i.h.bf16 %v1033_v35  ;;  %v1034_v39 = vunpack.i.l.bf16 %v1033_v35  ;;  %v332_v48 = vsel %vm331_vm8, %v326_v40, %v1039_v32 }
 0x169   : > { %911 = vmatprep.subr.bf16.mxu0 %v910_v36 }
 0x16a   : > { %913 = vmatpush1.bf16.msra.mxu0 %v912_v37  ;;  %v322_v43 = vsel %vm320_vm9, %v1034_v39, %v1035_v38 }
 0x16b   : > { %v315_v45 = vpop.permute.xlu0 %314  ;;  %v337_v47 = vsel %vm1508_vm5, %v322_v43, %v333_v44  ;;  %v341_v50 = vpop.permute.xlu1 %340  ;;  %v354_v61 = vsel %vm1526_vm10, %v333_v44, %v322_v43 }
 0x16c   : > { %v321_v49 = vsel %vm320_vm9, %v315_v45, %v1034_v39  ;;  %v914_v51 = vpack.c.bf16 %v337_v47, %v305_v46 }
 0x16d   : > { %v336_v52 = vsel %vm1513_vm6, %v321_v49, %v332_v48  ;;  %v353_v59 = vsel %vm1530_vm11, %v332_v48, %v321_v49 }
 0x16e   : > { %915 = vmatprep.subr.bf16.mxu0 %v914_v51  ;;  %v916_v54 = vpack.c.bf16 %v336_v52, %v304_v53 }
 0x16f   : > { %v1043_v55 = vpop.permute.xlu0 %1042  ;;  %v368_v58 = vpop.permute.xlu1 %367 }
 0x170   : > { %v1045_v56 = vunpack.i.h.bf16 %v1043_v55  ;;  %v1044_v57 = vunpack.i.l.bf16 %v1043_v55  ;;  %917 = vmatpush1.bf16.msra.mxu0 %v916_v54 }
 0x172   : > { %v348_v60 = vsel %vm346_vm12, %v1044_v57, %v1045_v56  ;;  %v347_v62 = vsel %vm346_vm12, %v341_v50, %v1044_v57 }
 0x173   : > { %v366_v63 = vpop.permute.xlu0 %365  ;;  %v918_v2 = vpack.c.bf16 %v354_v61, %v348_v60  ;;  %v920_v3 = vpack.c.bf16 %v353_v59, %v347_v62  ;;  %v379_v4 = vpop.permute.xlu1 %378 }
 0x174   : > { %v371_v13 = vsel %vm1696_vm14, %v366_v63, %v368_v58 }
 0x175   : > { %919 = vmatprep.subr.bf16.mxu0 %v918_v2 }
 0x176   : > { %921 = vmatpush1.bf16.msra.mxu0 %v920_v3 }
 0x177   : > { %v377_v5 = vpop.permute.xlu0 %376  ;;  %v375_v6 = vpop.permute.xlu1 %374 }
 0x178   : > { %v382_v8 = vsel %vm380_vm13, %v377_v5, %v379_v4  ;;  %v381_v14 = vsel %vm380_vm13, %v375_v6, %v377_v5 }
 0x179   : > { %v386_v16 = vsel %vm1508_vm5, %v371_v13, %v382_v8  ;;  %v403_v24 = vsel %vm1526_vm10, %v382_v8, %v371_v13 }
 0x17b   : > { %v364_v7 = vpop.permute.xlu0 %363  ;;  %v390_v15 = vpop.permute.xlu1 %389 }
 0x17c   : > { %v370_v9 = vsel %vm1696_vm14, %v364_v7, %v366_v63  ;;  %vm425_vm14 = vcmask 588800  }
 0x17d   : > { %v385_v17 = vsel %vm1513_vm6, %v370_v9, %v381_v14  ;;  %v402_v26 = vsel %vm1530_vm11, %v381_v14, %v370_v9 }
 0x17f   : > { %v1048_v10 = vpop.permute.xlu0 %1047 }
 0x180   : > { %v1050_v11 = vunpack.i.h.bf16 %v1048_v10  ;;  %v1049_v12 = vunpack.i.l.bf16 %v1048_v10 }
 0x182   : > { %v397_v18 = vsel %vm395_vm15, %v1049_v12, %v1050_v11  ;;  %v396_v19 = vsel %vm395_vm15, %v390_v15, %v1049_v12 }
 0x183   : > { %v922_v20 = vpack.c.bf16 %v397_v18, %v386_v16  ;;  %v924_v22 = vpack.c.bf16 %v396_v19, %v385_v17 }
 0x185   : > { %923 = vmatprep.subr.bf16.mxu0 %v922_v20 }
 0x186   : > { %925 = vmatpush1.bf16.msra.mxu0 %v924_v22 }
 0x187   : > { %445 = vmatprep.subr.mxu0 %v403_v24 }
 0x18a   : > { %446 = vmatpush1.msra.mxu0 %v402_v26 }
 0x18b   : > { %901 = vmatmul.mubr.msk.f32.vlgmr.msra.gmra.mrb[0].mxu0 %vm425_vm14, %v406_v25 }
 0x25e   : > { %v495_v27 = vpop.f32.mrb[0].mxu0 }
 0x25f   : > { %v497_v28 = vpop.f32.mrb[1].mxu0  ;;  %v503_v29 = vmul.f32 %v495_v27, %v495_v27 }
 0x260   : > { %v504_v30 = vmul.f32 %v497_v28, %v497_v28  ;;  %v500_v31 = vadd.f32 %v497_v28, %v495_v27 }
 0x262   : > { %501 = vadd.xlane.f32.xlu0 %v500_v31  ;;  %v505_v32 = vadd.f32 %v504_v30, %v503_v29 }
 0x264   : > { %506 = vadd.xlane.f32.xlu1 %v505_v32 }
 0x2ef   : > { %v502_v33 = vpop.xlane.xlu0 %501 }
 0x2f0   : > { %v508_v34 = vmul.f32 0.00390625, %v502_v33 }
 0x2f1   : > { %v507_v35 = vpop.xlane.xlu1 %506 }
 0x2f2   : > { %v509_v36 = vmul.f32 0.00390625, %v507_v35  ;;  %v510_v37 = vmul.f32 %v508_v34, %v508_v34  ;;  %v512_v40 = vsub.f32 %v495_v27, %v508_v34  ;;  %v513_v43 = vsub.f32 %v497_v28, %v508_v34 }
 0x2f4   : > { %v511_v38 = vsub.f32 %v509_v36, %v510_v37 }
 0x2f6   : > { %v514_v39 = vadd.f32 1e-05, %v511_v38 }
 0x2f8   : > { %1081 = vrsqrt.f32 %v514_v39 }
 0x302   : > { %v1082_v44 = vpop.eup %1081 }
 0x303   : > { %v517_v45 = vmul.f32 %v1082_v44, %v513_v43  ;;  %v516_v46 = vmul.f32 %v1082_v44, %v512_v40 }
 0x305   : > { %v519_v47 = vmax.f32 %v517_v45, 0.0  ;;  %v518_v48 = vmax.f32 %v516_v46, 0.0 }
 0x307   : > { %524 = vrot.lane.b32.xlu1 %v519_v47, %s1247_s24  ;;  %522 = vrot.lane.b32.xlu0 %v518_v48, %s1247_s24  ;;  %s1258_s24 = smov [#allocation10]  }
 0x30b   : > { %533 = vrot.lane.b32.xlu1 %v518_v48, %s1248_s18  ;;  %537 = vrot.lane.b32.xlu0 %v519_v47, %s1246_s20  ;;  %s1645_s20 = scalar_lea.hbm %s1692_s3, %s909_s9  ;;  %s1175_s18 = sshll.u32 %s1258_s24, 4  ;;  %s1176_s18 = int_to_ptr.vmem [resolvable:$false] %s1175_s18 }
 0x30c   : > { %p1178_p8 = scmp.lt.s32.totalorder %s1647_s11, %s1176_s18 }
 0x379   : > { %v525_v49 = vpop.permute.xlu1 %524  ;;  %v523_v50 = vpop.permute.xlu0 %522 }
 0x37a   : > { %532 = vst.msk [vmem:[#allocation2 + $0x10] sm:$0xff] %vm251_vm2, %v525_v49  ;;  %v526_v51 = vsel %vm251_vm2, %v523_v50, %v525_v49 }
 0x37b   : > { %530 = vst.msk [vmem:[#allocation2] sm:$0xff] %vm256_vm0, %v523_v50  ;;  %vm1716_vm0 = vcmask 769024  }
 0x37d   : > { %v534_v52 = vpop.permute.xlu1 %533  ;;  %v538_v53 = vpop.permute.xlu0 %537 }
 0x37e   : > { %536 = vst.msk [vmem:[#allocation2] sm:$0xff] %vm263_vm1, %v534_v52  ;;  %vm1717_vm1 = vmmov %vm1716_vm0 }
 0x37f   : > { %540 = vst.msk [vmem:[#allocation2 + $0x10] sm:$0xff] %vm268_vm3, %v538_v53 }
 0x385   : > { %v541_v54 = vld [vmem:[#allocation2] sm:$0xff] }
 0x386   : > { %v543_v55 = vld [vmem:[#allocation2 + $0x10] sm:$0xff]  ;;  %547 = vrot.lane.b32.xlu1 %v541_v54, %s1249_s21 }
 0x387   : > { %v1051_v56 = vpack.i.bf16 %v543_v55, %v526_v51 }
 0x389   : > { %1052 = vrot.lane.b32.xlu0 %v1051_v56, %s1249_s21  ;;  %s1177_s21 = scalar_lea.vmem %s1176_s18, 512 }
 0x38a   : > { %561 = vrot.lane.b32.xlu1 %v541_v54, %s1250_s23  ;;  %p1179_p12 = scmp.lt.s32.totalorder %s1177_s21, %s1171_s27 }
 0x38c   : > { %p1180_p3 = por %p1179_p12, %p1178_p8 }
 0x38d   : > { %1057 = vrot.lane.b32.xlu0 %v1051_v56, %s1250_s23 }
 0x38e   : > { %1067 = vrot.lane.b32.xlu1 %v1051_v56, %s1251_s28  ;;  %p1181_p7 = pnand %p1180_p3, %p1174_p4 }
 0x391   : > { %1062 = vrot.lane.b32.xlu0 %v1051_v56, %s1252_s22 }
 0x392   : > { %593 = vrot.lane.b32.xlu1 %v541_v54, %s1251_s28 }
 0x395   : > { %583 = vrot.lane.b32.xlu0 %v541_v54, %s1252_s22 }
 0x396   : > { %607 = vrot.lane.b32.xlu1 %v541_v54, %s1253_s4 }
 0x399   : > { %1072 = vrot.lane.b32.xlu0 %v1051_v56, %s1253_s4 }
 0x39a   : > { %633 = vrot.lane.b32.xlu1 %v543_v55, %s1254_s5 }
 0x39d   : > { %631 = vrot.lane.b32.xlu0 %v526_v51, %s1254_s5 }
 0x39e   : > { %643 = vrot.lane.b32.xlu1 %v543_v55, %s1255_s6 }
 0x3a1   : > { %641 = vrot.lane.b32.xlu0 %v526_v51, %s1255_s6 }
 0x3a2   : > { %639 = vrot.lane.b32.xlu1 %v541_v54, %s1255_s6 }
 0x3a5   : > { %629 = vrot.lane.b32.xlu0 %v541_v54, %s1254_s5 }
 0x3a6   : > { %653 = vrot.lane.b32.xlu1 %v541_v54, %s1256_s8 }
 0x3a9   : > { %1077 = vrot.lane.b32.xlu0 %v1051_v56, %s1256_s8 }
 0x3f8   : > { %v548_v57 = vpop.permute.xlu1 %547 }
 0x3fb   : > { %v1053_v58 = vpop.permute.xlu0 %1052 }
 0x3fc   : > { %v1055_v59 = vunpack.i.h.bf16 %v1053_v58  ;;  %v1054_v60 = vunpack.i.l.bf16 %v1053_v58  ;;  %v562_v61 = vpop.permute.xlu1 %561 }
 0x3fe   : > { %v554_v62 = vsel %vm282_vm4, %v1054_v60, %v1055_v59  ;;  %v553_v63 = vsel %vm282_vm4, %v548_v57, %v1054_v60 }
 0x3ff   : > { %v1058_v2 = vpop.permute.xlu0 %1057  ;;  %v558_v6 = vsel %vm1508_vm5, %v554_v62, %v526_v51  ;;  %v557_v7 = vsel %vm1513_vm6, %v553_v63, %v541_v54  ;;  %v574_v22 = vsel %vm1526_vm10, %v526_v51, %v554_v62  ;;  %v573_v30 = vsel %vm1530_vm11, %v541_v54, %v553_v63 }
 0x400   : > { %v1060_v3 = vunpack.i.h.bf16 %v1058_v2  ;;  %v1059_v4 = vunpack.i.l.bf16 %v1058_v2  ;;  %v1068_v5 = vpop.permute.xlu1 %1067  ;;  %v669_v2 = vld [vmem:[#allocation9] sm:$0xff] }
 0x401   : > { %v1070_v8 = vunpack.i.h.bf16 %v1068_v5  ;;  %v1069_v9 = vunpack.i.l.bf16 %v1068_v5 }
 0x402   : > { %v568_v10 = vsel %vm297_vm7, %v1059_v4, %v1060_v3  ;;  %v567_v11 = vsel %vm297_vm7, %v562_v61, %v1059_v4 }
 0x403   : > { %v1063_v12 = vpop.permute.xlu0 %1062  ;;  %v926_v13 = vpack.c.bf16 %v568_v10, %v558_v6  ;;  %v928_v14 = vpack.c.bf16 %v567_v11, %v557_v7  ;;  %v600_v18 = vsel %vm331_vm8, %v1069_v9, %v1070_v8 }
 0x404   : > { %v1065_v15 = vunpack.i.h.bf16 %v1063_v12  ;;  %v1064_v16 = vunpack.i.l.bf16 %v1063_v12  ;;  %v594_v17 = vpop.permute.xlu1 %593 }
 0x405   : > { %927 = vmatprep.subr.bf16.mxu1 %v926_v13  ;;  %v599_v25 = vsel %vm331_vm8, %v594_v17, %v1069_v9 }
 0x406   : > { %v590_v19 = vsel %vm320_vm9, %v1064_v16, %v1065_v15  ;;  %929 = vmatpush1.bf16.msra.mxu1 %v928_v14 }
 0x407   : > { %v584_v20 = vpop.permute.xlu0 %583  ;;  %v604_v24 = vsel %vm1508_vm5, %v590_v19, %v600_v18  ;;  %v620_v38 = vsel %vm1526_vm10, %v600_v18, %v590_v19 }
 0x408   : > { %v589_v26 = vsel %vm320_vm9, %v584_v20, %v1064_v16  ;;  %v930_v27 = vpack.c.bf16 %v604_v24, %v574_v22  ;;  %v608_v29 = vpop.permute.xlu1 %607 }
 0x409   : > { %v603_v28 = vsel %vm1513_vm6, %v589_v26, %v599_v25  ;;  %v619_v36 = vsel %vm1530_vm11, %v599_v25, %v589_v26 }
 0x40a   : > { %931 = vmatprep.subr.bf16.mxu1 %v930_v27  ;;  %v932_v31 = vpack.c.bf16 %v603_v28, %v573_v30 }
 0x40b   : > { %v1073_v32 = vpop.permute.xlu0 %1072 }
 0x40c   : > { %v1075_v33 = vunpack.i.h.bf16 %v1073_v32  ;;  %v1074_v34 = vunpack.i.l.bf16 %v1073_v32  ;;  %933 = vmatpush1.bf16.msra.mxu1 %v932_v31  ;;  %v634_v35 = vpop.permute.xlu1 %633 }
 0x40e   : > { %v614_v37 = vsel %vm346_vm12, %v1074_v34, %v1075_v33  ;;  %v613_v39 = vsel %vm346_vm12, %v608_v29, %v1074_v34 }
 0x40f   : > { %v632_v40 = vpop.permute.xlu0 %631  ;;  %v934_v43 = vpack.c.bf16 %v620_v38, %v614_v37  ;;  %v936_v44 = vpack.c.bf16 %v619_v36, %v613_v39 }
 0x410   : > { %v644_v45 = vpop.permute.xlu1 %643  ;;  %v636_v54 = vsel %vm1717_vm1, %v632_v40, %v634_v35 }
 0x411   : > { %935 = vmatprep.subr.bf16.mxu1 %v934_v43 }
 0x412   : > { %937 = vmatpush1.bf16.msra.mxu1 %v936_v44 }
 0x413   : > { %v642_v46 = vpop.permute.xlu0 %641 }
 0x414   : > { %v640_v47 = vpop.permute.xlu1 %639  ;;  %v646_v49 = vsel %vm380_vm13, %v642_v46, %v644_v45 }
 0x415   : > { %v645_v55 = vsel %vm380_vm13, %v640_v47, %v642_v46  ;;  %v650_v57 = vsel %vm1508_vm5, %v636_v54, %v646_v49  ;;  %v666_v63 = vsel %vm1526_vm10, %v646_v49, %v636_v54 }
 0x417   : > { %v630_v48 = vpop.permute.xlu0 %629 }
 0x418   : > { %v635_v50 = vsel %vm1716_vm0, %v630_v48, %v632_v40  ;;  %v654_v56 = vpop.permute.xlu1 %653 }
 0x419   : > { %v649_v58 = vsel %vm1513_vm6, %v635_v50, %v645_v55  ;;  %v665_v21 = vsel %vm1530_vm11, %v645_v55, %v635_v50 }
 0x41b   : > { %v1078_v51 = vpop.permute.xlu0 %1077 }
 0x41c   : > { %v1080_v52 = vunpack.i.h.bf16 %v1078_v51  ;;  %v1079_v53 = vunpack.i.l.bf16 %v1078_v51 }
 0x41e   : > { %v660_v59 = vsel %vm395_vm15, %v1079_v53, %v1080_v52  ;;  %v659_v60 = vsel %vm395_vm15, %v654_v56, %v1079_v53 }
 0x41f   : > { %v938_v61 = vpack.c.bf16 %v660_v59, %v650_v57  ;;  %v940_v62 = vpack.c.bf16 %v659_v60, %v649_v58 }
 0x421   : > { %939 = vmatprep.subr.bf16.mxu1 %v938_v61 }
 0x422   : > { %941 = vmatpush1.bf16.msra.mxu1 %v940_v62 }
 0x423   : > { %707 = vmatprep.subr.mxu1 %v666_v63 }
 0x426   : > { %708 = vmatpush1.msra.mxu1 %v665_v21 }
 0x427   : > { %902 = vmatmul.mubr.msk.f32.vlgmr.msra.gmra.mrb[0].mxu1 %vm425_vm14, %v669_v2 }
 0x4fa   : > { %v757_v23 = vpop.f32.mrb[0].mxu1 }
 0x4fb   : > { %v759_v3 = vpop.f32.mrb[1].mxu1  ;;  %v765_v4 = vmul.f32 %v757_v23, %v757_v23 }
 0x4fc   : > { %v766_v5 = vmul.f32 %v759_v3, %v759_v3  ;;  %v762_v6 = vadd.f32 %v759_v3, %v757_v23 }
 0x4fe   : > { %763 = vadd.xlane.f32.xlu0 %v762_v6  ;;  %v767_v7 = vadd.f32 %v766_v5, %v765_v4 }
 0x500   : > { %768 = vadd.xlane.f32.xlu1 %v767_v7 }
 0x58b   : > { %v764_v41 = vpop.xlane.xlu0 %763 }
 0x58c   : > { %v770_v8 = vmul.f32 0.00390625, %v764_v41 }
 0x58d   : > { %v769_v9 = vpop.xlane.xlu1 %768 }
 0x58e   : > { %v771_v10 = vmul.f32 0.00390625, %v769_v9  ;;  %v772_v11 = vmul.f32 %v770_v8, %v770_v8  ;;  %v774_v13 = vsub.f32 %v757_v23, %v770_v8  ;;  %v775_v14 = vsub.f32 %v759_v3, %v770_v8 }
 0x590   : > { %v773_v42 = vsub.f32 %v771_v10, %v772_v11 }
 0x592   : > { %v776_v12 = vadd.f32 1e-05, %v773_v42 }
 0x594   : > { %1083 = vrsqrt.f32 %v776_v12 }
 0x59e   : > { %v1084_v15 = vpop.eup %1083 }
 0x59f   : > { %v778_v16 = vmul.f32 %v1084_v15, %v774_v13  ;;  %v779_v17 = vmul.f32 %v1084_v15, %v775_v14 }
 0x5a1   : > { %v780_v18 = vadd.f32 %v778_v16, %v1460_v1  ;;  %v781_v19 = vadd.f32 %v779_v17, %v1458_v0 }
 0x5a3   : > { %782 = vst [vmem:[%s211_s10] sm:$0xff] %v780_v18  ;;  %783 = vst [vmem:[%s211_s10 + $0x8] sm:$0xff] %v781_v19 }
 0x5a4   : > { %1184 = shalt.err (!%p1181_p7)
}
 0x5a5   : > { %s1185_s17 = scalar_lea.hbm %s1645_s20, 256  ;;  %s1189_s22 = scalar_lea.hbm %s1692_s3, 512 }
 0x5a6   : > { %p1186_p10 = scmp.ne.s32.totalorder %s1645_s20, %s1185_s17  ;;  %p1190_p0 = scmp.lt.u32.totalorder %s1645_s20, %s1692_s3 }
 0x5a7   : > { %p1191_p11 = scmp.lt.u32.totalorder %s1189_s22, %s1185_s17  ;;  %p1193_p2 = scmp.lt.u32.totalorder %s1185_s17, %s1645_s20 }
 0x5a8   : > { %p1187_p13 = pnand %p1186_p10, %p1398_p6 }
 0x5a9   : > { %p1192_p9 = por %p1191_p11, %p1190_p0 }
 0x5aa   : > { %p1188_p5 = pneg %p1187_p13 }
 0x5ab   : > { %p1194_p1 = por %p1193_p2, %p1192_p9 }
 0x5ad   : > { %p1195_p4 = pnand %p1194_p1, %p1188_p5 }
 0x5af   : > { %1198 = shalt.err (!%p1195_p4)
}
 0x5b0   : > { %952 = dma.vmem_to_hbm [thread:$0]  (%p1398_p6), %s1647_s11, 256, %s1645_s20, %s785_s16  }
 0x5b1 PF: > { %s811_s6 = sand.u32 1, %s1229_s12   ;;  %p1718_p8 = scmp.ne.s32.totalorder %s1698_s19, 0 }
 0x5b2   : > { %p1719_p12 = scmp.ge.s32.totalorder %s1241_s15, 2  ;;  %s812_s8 = scalar_lea.sflag [#allocation6], %s811_s6 }
 0x5b4   : > { %p966_p3 = pnand %p1719_p12, %p1718_p8 }
 0x5b6   : > { %1224 = dma.done.wait (!%p966_p3), %s812_s8, 256  }
 0x5b7   : > { %1226 = vsyncadd (!%p966_p3), %s812_s8, 4294967040  ;;  %p17_p7 = scmp.ge.s32.totalorder %s1335_s26, 4   ;;  %s1720_s12 = smov %s1233_s13 }
 0x5b8   : > { %s1721_s13 = smov %s1237_s14  ;;  %s1722_s14 = smov %s1394_s25 }
 0x5b9   : > { %s1723_s15 = smov %s1335_s26  ;;  %19 = sbr.rel (!%p17_p7) target bundleno = 6 (0x6), region = 85 }
 0x5c0   :  { %817 = vsyncpa [#allocation5], 1 }
 0x5c1   :  { %819 = vsyncpa [#allocation5 + $0x1], 1 }
 0x5c2   :  { %820 = vsyncpa [#allocation8], 1 }
 0x5c3   :  { %821 = vsyncpa [#allocation6], 1 }
 0x5c4   :  { %823 = vsyncpa [#allocation6 + $0x1], 1 }

</bundles_post_ra>
